<compile_context>
chip_gen: v5e
topology: v5e:2x2
jax: 0.10.0
libtpu: 0.0.40
codegen_flags: <defaults>
</compile_context>

<pallas_src>
import functools

import jax
import jax.numpy as jnp
from jax.experimental import pallas as pl
from jax.experimental.pallas import tpu as pltpu


# ------------------------------------------------------------------ kernel
def _fused_encoder_kernel(x_ref, hxk_ref, mlpw_ref, mlpb_ref,
                          r_ref, ipw_ref, ipb_ref, attw_ref, attb_ref,
                          out_ref, newhx_ref, *, num_layers, pre_k):
    # x_ref:    (1, N, Fin)        raw encoder input for this batch element
    # hxk_ref:  (1, L*K, N, D)     hidden history, layer-major ([l*K + k])
    # mlpw:     (Fin, D), mlpb: (1, D)
    # r_ref:    (L*K, N, D)
    # ipw_ref:  (L, 2D, D), ipb_ref: (L, 1, D)
    # attw_ref: (L, N, D),  attb_ref: (L, 1, 1)
    # out_ref:  (1, N, D)
    # newhx:    (1, L*K, N, D)
    L, K = num_layers, pre_k
    _, _, N, D = hxk_ref.shape
    Fin = x_ref.shape[2]

    # ---- input MLP: Fin is tiny, do it as VPU broadcast-FMAs (skip the MXU)
    x = x_ref[0]                                   # (N, Fin)
    mlpw = mlpw_ref[...]                           # (Fin, D)
    cur = mlpb_ref[...] + x[:, 0:1] * mlpw[0:1, :]
    for i in range(1, Fin):
        cur = cur + x[:, i:i + 1] * mlpw[i:i + 1, :]
    # cur: (N, D) float32 — stays resident in vregs/VMEM across all layers.

    # ---- L GMSDR cell layers, statically unrolled inside the kernel --------
    for l in range(L):
        base = l * K
        hxk = hxk_ref[0, base:base + K]            # (K, N, D)
        preH = hxk[K - 1]                          # (N, D)   (pre_v == 1)

        # iplinear(cat([inputs, preH], -1)): one MXU dot, contraction 2D,
        # batched over all N node rows at once.
        cat = jnp.concatenate([cur, preH], axis=-1)                 # (N, 2D)
        ips = (jnp.dot(cat, ipw_ref[l], preferred_element_type=jnp.float32)
               + ipb_ref[l])                                        # (N, D)

        # attention over K on new_states = hx_k + R
        # (kept as VPU/XLU reductions — a (K, N*D)@(N*D,1) matmul would waste
        #  the MXU on a single output column)
        new_states = hxk + r_ref[base:base + K]                     # (K, N, D)
        s = jnp.sum(new_states * attw_ref[l][None], axis=2,
                    keepdims=True)                                  # (K, N, 1)
        scores = jnp.sum(s, axis=1, keepdims=True) + attb_ref[l]    # (K, 1, 1)
        m = jnp.max(scores, axis=0, keepdims=True)
        e = jnp.exp(scores - m)
        w = e / jnp.sum(e, axis=0, keepdims=True)                   # softmax(K)
        att = jnp.sum(new_states * w, axis=0)                       # (N, D)

        out = ips + att                                             # (N, D)

        # new hx_k = [hx_k[1:], out]: direct slice writes, no concatenate.
        # With D=128 these are full-width unmasked vector stores.
        newhx_ref[0, base:base + K - 1] = hxk[1:K]
        newhx_ref[0, base + K - 1] = out
        # TODO(synk): when this cell is stepped over time, switch hx_k to a
        # ring buffer (input_output_aliases + rotating slot index) so the K-1
        # unchanged history slices are never rewritten.

        cur = out

    out_ref[0] = cur


# ------------------------------------------------------------------ wrapper
def fused_encoder_forward(inputs, hx_k, params, num_nodes, input_dim):
    """inputs: (B, num_nodes*input_dim); hx_k: (B, L, K, N, D).

    Returns (output (B, N*D), new_hx_k (B, L, K, N, D)).
    """
    B, L, K, N, D = hx_k.shape
    x = inputs.reshape(B, num_nodes, input_dim)
    hx_flat = hx_k.reshape(B, L * K, N, D)          # pure reshape, free

    kernel = functools.partial(_fused_encoder_kernel, num_layers=L, pre_k=K)

    out, new_hx = pl.pallas_call(
        kernel,
        out_shape=(jax.ShapeDtypeStruct((B, N, D), jnp.float32),
                   jax.ShapeDtypeStruct((B, L * K, N, D), jnp.float32)),
        grid=(B,),
        in_specs=[
            pl.BlockSpec((1, N, input_dim), lambda b: (b, 0, 0)),
            pl.BlockSpec((1, L * K, N, D), lambda b: (b, 0, 0, 0)),
            pl.BlockSpec((input_dim, D), lambda b: (0, 0)),
            pl.BlockSpec((1, D), lambda b: (0, 0)),
            pl.BlockSpec((L * K, N, D), lambda b: (0, 0, 0)),
            pl.BlockSpec((L, 2 * D, D), lambda b: (0, 0, 0)),
            pl.BlockSpec((L, 1, D), lambda b: (0, 0, 0)),
            pl.BlockSpec((L, N, D), lambda b: (0, 0, 0)),
            pl.BlockSpec((L, 1, 1), lambda b: (0, 0, 0)),
        ],
        out_specs=(
            pl.BlockSpec((1, N, D), lambda b: (b, 0, 0)),
            pl.BlockSpec((1, L * K, N, D), lambda b: (b, 0, 0, 0)),
        ),
        compiler_params=pltpu.CompilerParams(
            dimension_semantics=("parallel",)),   # batch sharded across TCs (v7x)
    )(x, hx_flat, params["mlp_w"], params["mlp_b"],
      params["R"].reshape(L * K, N, D), params["ipw"], params["ipb"],
      params["attw"], params["attb"])

    return out.reshape(B, num_nodes * D), new_hx.reshape(B, L, K, N, D)


# ------------------------------------------------------------------ pure-JAX reference
def _ref_encoder(inputs, hx_k, params, num_nodes, input_dim):
    B, L, K, N, D = hx_k.shape
    x = inputs.reshape(B, num_nodes, input_dim)
    out = x @ params["mlp_w"] + params["mlp_b"]
    new_hx = []
    for l in range(L):
        hxk = hx_k[:, l]                                       # (B, K, N, D)
        preH = hxk[:, -1]                                      # (B, N, D)
        cat = jnp.concatenate([out, preH], axis=-1)
        ips = cat @ params["ipw"][l] + params["ipb"][l]
        new_states = hxk + params["R"][l][None]
        flat = new_states.reshape(B, K, N * D)
        scores = flat @ params["attw"][l].reshape(N * D, 1) + params["attb"][l][0, 0]
        w = jax.nn.softmax(scores, axis=1)
        att = (flat * w).sum(axis=1).reshape(B, N, D)
        out = ips + att
        new_hx.append(jnp.concatenate([hxk[:, 1:], out[:, None]], axis=1))
    return out.reshape(B, num_nodes * D), jnp.stack(new_hx, axis=1)


# ------------------------------------------------------------------ main
if __name__ == "__main__":
    # batch, input_dim, rnn_units, num_nodes, pre_k, layers
    # rnn_units = 128 so every kernel store is a full 128-lane (lane-dense) vst.
    B, input_dim, D, N, K, L = 2, 4, 128, 8, 4, 2

    key = jax.random.PRNGKey(0)
    ks = jax.random.split(key, 9)
    params = {
        "mlp_w": 0.1 * jax.random.normal(ks[0], (input_dim, D), jnp.float32),
        "mlp_b": 0.1 * jax.random.normal(ks[1], (1, D), jnp.float32),
        "R":     0.1 * jax.random.normal(ks[2], (L, K, N, D), jnp.float32),
        "ipw":   0.1 * jax.random.normal(ks[3], (L, 2 * D, D), jnp.float32),
        "ipb":   0.1 * jax.random.normal(ks[4], (L, 1, D), jnp.float32),
        "attw":  0.1 * jax.random.normal(ks[5], (L, N, D), jnp.float32),
        "attb":  0.1 * jax.random.normal(ks[6], (L, 1, 1), jnp.float32),
    }
    inputs = jax.random.normal(ks[7], (B, N * input_dim), jnp.float32)
    hx_k = jax.random.normal(ks[8], (B, L, K, N, D), jnp.float32)

    out, new_hx_k = fused_encoder_forward(inputs, hx_k, params, N, input_dim)
    out = jax.block_until_ready(out)
    new_hx_k = jax.block_until_ready(new_hx_k)

    ref_out, ref_hx = _ref_encoder(inputs, hx_k, params, N, input_dim)
    assert out.shape == (B, N * D) and new_hx_k.shape == (B, L, K, N, D)
    assert jnp.allclose(out, ref_out, atol=1e-3, rtol=1e-3)
    assert jnp.allclose(new_hx_k, ref_hx, atol=1e-3, rtol=1e-3)

    print("KERNEL_OK")
</pallas_src>

<mosaic_0001>
module attributes {stable_mosaic.version = 11 : i64} {
  func.func @_fused_encoder_kernel(%arg0: i32, %arg1: memref<1x8x4xf32, #tpu.memory_space<vmem>>, %arg2: memref<1x8x8x128xf32, #tpu.memory_space<vmem>>, %arg3: memref<4x128xf32, #tpu.memory_space<vmem>>, %arg4: memref<1x128xf32, #tpu.memory_space<vmem>>, %arg5: memref<8x8x128xf32, #tpu.memory_space<vmem>>, %arg6: memref<2x256x128xf32, #tpu.memory_space<vmem>>, %arg7: memref<2x1x128xf32, #tpu.memory_space<vmem>>, %arg8: memref<2x8x128xf32, #tpu.memory_space<vmem>>, %arg9: memref<2x1x1xf32, #tpu.memory_space<vmem>>, %arg10: memref<1x8x128xf32, #tpu.memory_space<vmem>>, %arg11: memref<1x8x8x128xf32, #tpu.memory_space<vmem>>) attributes {dimension_semantics = [#tpu.dimension_semantics<parallel>], iteration_bounds = array<i64: 2>, scalar_prefetch = 0 : i64, scratch_operands = 0 : i64, tpu.core_type = #tpu.core_type<tc>, window_params = [{transform_indices = @transform_0, window_bounds = array<i64: 1, 8, 4>}, {transform_indices = @transform_1, window_bounds = array<i64: 1, 8, 8, 128>}, {pipeline_mode = #tpu.pipeline_mode<synchronous>, transform_indices = @transform_2, window_bounds = array<i64: 4, 128>}, {pipeline_mode = #tpu.pipeline_mode<synchronous>, transform_indices = @transform_3, window_bounds = array<i64: 1, 128>}, {pipeline_mode = #tpu.pipeline_mode<synchronous>, transform_indices = @transform_4, window_bounds = array<i64: 8, 8, 128>}, {pipeline_mode = #tpu.pipeline_mode<synchronous>, transform_indices = @transform_5, window_bounds = array<i64: 2, 256, 128>}, {pipeline_mode = #tpu.pipeline_mode<synchronous>, transform_indices = @transform_6, window_bounds = array<i64: 2, 1, 128>}, {pipeline_mode = #tpu.pipeline_mode<synchronous>, transform_indices = @transform_7, window_bounds = array<i64: 2, 8, 128>}, {pipeline_mode = #tpu.pipeline_mode<synchronous>, transform_indices = @transform_8, window_bounds = array<i64: 2, 1, 1>}, {transform_indices = @transform_9, window_bounds = array<i64: 1, 8, 128>}, {transform_indices = @transform_10, window_bounds = array<i64: 1, 8, 8, 128>}]} {
    %c0 = arith.constant 0 : index
    %c0_0 = arith.constant 0 : index
    %c0_1 = arith.constant 0 : index
    %0 = vector.load %arg1[%c0, %c0_0, %c0_1] : memref<1x8x4xf32, #tpu.memory_space<vmem>>, vector<1x8x4xf32>
    %1 = vector.shape_cast %0 : vector<1x8x4xf32> to vector<8x4xf32>
    %c0_2 = arith.constant 0 : index
    %c0_3 = arith.constant 0 : index
    %2 = vector.load %arg3[%c0_2, %c0_3] : memref<4x128xf32, #tpu.memory_space<vmem>>, vector<4x128xf32>
    %c0_4 = arith.constant 0 : index
    %c0_5 = arith.constant 0 : index
    %3 = vector.load %arg4[%c0_4, %c0_5] : memref<1x128xf32, #tpu.memory_space<vmem>>, vector<1x128xf32>
    %4 = vector.extract_strided_slice %1 {offsets = [0, 0], sizes = [8, 1], strides = [1, 1]} : vector<8x4xf32> to vector<8x1xf32>
    %5 = vector.extract_strided_slice %2 {offsets = [0, 0], sizes = [1, 128], strides = [1, 1]} : vector<4x128xf32> to vector<1x128xf32>
    %6 = vector.broadcast %4 : vector<8x1xf32> to vector<8x128xf32>
    %7 = vector.broadcast %5 : vector<1x128xf32> to vector<8x128xf32>
    %8 = arith.mulf %6, %7 : vector<8x128xf32>
    %9 = vector.broadcast %3 : vector<1x128xf32> to vector<8x128xf32>
    %10 = arith.addf %9, %8 : vector<8x128xf32>
    %11 = vector.extract_strided_slice %1 {offsets = [0, 1], sizes = [8, 1], strides = [1, 1]} : vector<8x4xf32> to vector<8x1xf32>
    %12 = vector.extract_strided_slice %2 {offsets = [1, 0], sizes = [1, 128], strides = [1, 1]} : vector<4x128xf32> to vector<1x128xf32>
    %13 = vector.broadcast %11 : vector<8x1xf32> to vector<8x128xf32>
    %14 = vector.broadcast %12 : vector<1x128xf32> to vector<8x128xf32>
    %15 = arith.mulf %13, %14 : vector<8x128xf32>
    %16 = arith.addf %10, %15 : vector<8x128xf32>
    %17 = vector.extract_strided_slice %1 {offsets = [0, 2], sizes = [8, 1], strides = [1, 1]} : vector<8x4xf32> to vector<8x1xf32>
    %18 = vector.extract_strided_slice %2 {offsets = [2, 0], sizes = [1, 128], strides = [1, 1]} : vector<4x128xf32> to vector<1x128xf32>
    %19 = vector.broadcast %17 : vector<8x1xf32> to vector<8x128xf32>
    %20 = vector.broadcast %18 : vector<1x128xf32> to vector<8x128xf32>
    %21 = arith.mulf %19, %20 : vector<8x128xf32>
    %22 = arith.addf %16, %21 : vector<8x128xf32>
    %23 = vector.extract_strided_slice %1 {offsets = [0, 3], sizes = [8, 1], strides = [1, 1]} : vector<8x4xf32> to vector<8x1xf32>
    %24 = vector.extract_strided_slice %2 {offsets = [3, 0], sizes = [1, 128], strides = [1, 1]} : vector<4x128xf32> to vector<1x128xf32>
    %25 = vector.broadcast %23 : vector<8x1xf32> to vector<8x128xf32>
    %26 = vector.broadcast %24 : vector<1x128xf32> to vector<8x128xf32>
    %27 = arith.mulf %25, %26 : vector<8x128xf32>
    %28 = arith.addf %22, %27 : vector<8x128xf32>
    %c0_6 = arith.constant 0 : index
    %c0_7 = arith.constant 0 : index
    %c0_8 = arith.constant 0 : index
    %c0_9 = arith.constant 0 : index
    %29 = vector.load %arg2[%c0_6, %c0_7, %c0_8, %c0_9] : memref<1x8x8x128xf32, #tpu.memory_space<vmem>>, vector<1x4x8x128xf32>
    %30 = vector.shape_cast %29 : vector<1x4x8x128xf32> to vector<4x8x128xf32>
    %31 = vector.extract_strided_slice %30 {offsets = [3, 0, 0], sizes = [1, 8, 128], strides = [1, 1, 1]} : vector<4x8x128xf32> to vector<1x8x128xf32>
    %32 = vector.shape_cast %31 : vector<1x8x128xf32> to vector<8x128xf32>
    %33 = tpu.concatenate %28, %32 in 1 : vector<8x128xf32>, vector<8x128xf32> -> vector<8x256xf32>
    %c0_10 = arith.constant 0 : index
    %c0_11 = arith.constant 0 : index
    %c0_12 = arith.constant 0 : index
    %34 = vector.load %arg6[%c0_10, %c0_11, %c0_12] : memref<2x256x128xf32, #tpu.memory_space<vmem>>, vector<1x256x128xf32>
    %35 = vector.shape_cast %34 : vector<1x256x128xf32> to vector<256x128xf32>
    %cst = arith.constant dense<0.000000e+00> : vector<8x128xf32>
    %36 = tpu.matmul %33, %35, %cst {dimension_numbers = #tpu.dot_dimension_numbers<[1], [0], [0], [1], [0, 0, 1, 1], [], []>} : vector<8x256xf32>, vector<256x128xf32>, vector<8x128xf32> -> vector<8x128xf32>
    %c0_13 = arith.constant 0 : index
    %c0_14 = arith.constant 0 : index
    %c0_15 = arith.constant 0 : index
    %37 = vector.load %arg7[%c0_13, %c0_14, %c0_15] : memref<2x1x128xf32, #tpu.memory_space<vmem>>, vector<1x1x128xf32>
    %38 = vector.shape_cast %37 : vector<1x1x128xf32> to vector<1x128xf32>
    %39 = vector.broadcast %38 : vector<1x128xf32> to vector<8x128xf32>
    %40 = arith.addf %36, %39 : vector<8x128xf32>
    %c0_16 = arith.constant 0 : index
    %c0_17 = arith.constant 0 : index
    %c0_18 = arith.constant 0 : index
    %41 = vector.load %arg5[%c0_16, %c0_17, %c0_18] : memref<8x8x128xf32, #tpu.memory_space<vmem>>, vector<4x8x128xf32>
    %42 = arith.addf %30, %41 : vector<4x8x128xf32>
    %c0_19 = arith.constant 0 : index
    %c0_20 = arith.constant 0 : index
    %c0_21 = arith.constant 0 : index
    %43 = vector.load %arg8[%c0_19, %c0_20, %c0_21] : memref<2x8x128xf32, #tpu.memory_space<vmem>>, vector<1x8x128xf32>
    %44 = vector.shape_cast %43 : vector<1x8x128xf32> to vector<8x128xf32>
    %45 = vector.shape_cast %44 : vector<8x128xf32> to vector<1x8x128xf32>
    %46 = vector.broadcast %45 : vector<1x8x128xf32> to vector<4x8x128xf32>
    %47 = arith.mulf %42, %46 : vector<4x8x128xf32>
    %cst_22 = arith.constant dense<0.000000e+00> : vector<4x8xf32>
    %48 = vector.multi_reduction <add>, %47, %cst_22 [2] : vector<4x8x128xf32> to vector<4x8xf32>
    %49 = vector.shape_cast %48 : vector<4x8xf32> to vector<4x8x1xf32>
    %cst_23 = arith.constant dense<0.000000e+00> : vector<4x1xf32>
    %50 = vector.multi_reduction <add>, %49, %cst_23 [1] : vector<4x8x1xf32> to vector<4x1xf32>
    %51 = vector.shape_cast %50 : vector<4x1xf32> to vector<4x1x1xf32>
    %c0_24 = arith.constant 0 : index
    %c0_25 = arith.constant 0 : index
    %c0_26 = arith.constant 0 : index
    %52 = vector.load %arg9[%c0_24, %c0_25, %c0_26] : memref<2x1x1xf32, #tpu.memory_space<vmem>>, vector<1x1x1xf32>
    %53 = vector.shape_cast %52 : vector<1x1x1xf32> to vector<1x1xf32>
    %54 = vector.shape_cast %53 : vector<1x1xf32> to vector<1x1x1xf32>
    %55 = vector.broadcast %54 : vector<1x1x1xf32> to vector<4x1x1xf32>
    %56 = arith.addf %51, %55 : vector<4x1x1xf32>
    %cst_27 = arith.constant dense<0xFF800000> : vector<1x1xf32>
    %57 = vector.multi_reduction <maximumf>, %56, %cst_27 [0] : vector<4x1x1xf32> to vector<1x1xf32>
    %58 = vector.shape_cast %57 : vector<1x1xf32> to vector<1x1x1xf32>
    %59 = vector.broadcast %58 : vector<1x1x1xf32> to vector<4x1x1xf32>
    %60 = arith.subf %56, %59 : vector<4x1x1xf32>
    %61 = math.exp %60 : vector<4x1x1xf32>
    %cst_28 = arith.constant dense<0.000000e+00> : vector<1x1xf32>
    %62 = vector.multi_reduction <add>, %61, %cst_28 [0] : vector<4x1x1xf32> to vector<1x1xf32>
    %63 = vector.shape_cast %62 : vector<1x1xf32> to vector<1x1x1xf32>
    %64 = vector.broadcast %63 : vector<1x1x1xf32> to vector<4x1x1xf32>
    %65 = arith.divf %61, %64 : vector<4x1x1xf32>
    %66 = vector.broadcast %65 : vector<4x1x1xf32> to vector<4x8x128xf32>
    %67 = arith.mulf %42, %66 : vector<4x8x128xf32>
    %cst_29 = arith.constant dense<0.000000e+00> : vector<8x128xf32>
    %68 = vector.multi_reduction <add>, %67, %cst_29 [0] : vector<4x8x128xf32> to vector<8x128xf32>
    %69 = arith.addf %40, %68 : vector<8x128xf32>
    %70 = vector.extract_strided_slice %30 {offsets = [1, 0, 0], sizes = [3, 8, 128], strides = [1, 1, 1]} : vector<4x8x128xf32> to vector<3x8x128xf32>
    %c0_30 = arith.constant 0 : index
    %c0_31 = arith.constant 0 : index
    %c0_32 = arith.constant 0 : index
    %c0_33 = arith.constant 0 : index
    %71 = vector.load %arg11[%c0_30, %c0_31, %c0_32, %c0_33] : memref<1x8x8x128xf32, #tpu.memory_space<vmem>>, vector<1x3x8x128xf32>
    %72 = vector.shape_cast %71 : vector<1x3x8x128xf32> to vector<3x8x128xf32>
    %73 = vector.shape_cast %70 : vector<3x8x128xf32> to vector<1x3x8x128xf32>
    tpu.vector_store %arg11[%c0_30, %c0_31, %c0_32, %c0_33], %73 {strides = array<i32>} : memref<1x8x8x128xf32, #tpu.memory_space<vmem>>, vector<1x3x8x128xf32>,
    %c0_34 = arith.constant 0 : index
    %c3 = arith.constant 3 : index
    %c0_35 = arith.constant 0 : index
    %c0_36 = arith.constant 0 : index
    %74 = vector.load %arg11[%c0_34, %c3, %c0_35, %c0_36] : memref<1x8x8x128xf32, #tpu.memory_space<vmem>>, vector<1x1x8x128xf32>
    %75 = vector.shape_cast %74 : vector<1x1x8x128xf32> to vector<8x128xf32>
    %76 = vector.shape_cast %69 : vector<8x128xf32> to vector<1x1x8x128xf32>
    tpu.vector_store %arg11[%c0_34, %c3, %c0_35, %c0_36], %76 {strides = array<i32>} : memref<1x8x8x128xf32, #tpu.memory_space<vmem>>, vector<1x1x8x128xf32>,
    %c0_37 = arith.constant 0 : index
    %c4 = arith.constant 4 : index
    %c0_38 = arith.constant 0 : index
    %c0_39 = arith.constant 0 : index
    %77 = vector.load %arg2[%c0_37, %c4, %c0_38, %c0_39] : memref<1x8x8x128xf32, #tpu.memory_space<vmem>>, vector<1x4x8x128xf32>
    %78 = vector.shape_cast %77 : vector<1x4x8x128xf32> to vector<4x8x128xf32>
    %79 = vector.extract_strided_slice %78 {offsets = [3, 0, 0], sizes = [1, 8, 128], strides = [1, 1, 1]} : vector<4x8x128xf32> to vector<1x8x128xf32>
    %80 = vector.shape_cast %79 : vector<1x8x128xf32> to vector<8x128xf32>
    %81 = tpu.concatenate %69, %80 in 1 : vector<8x128xf32>, vector<8x128xf32> -> vector<8x256xf32>
    %c1 = arith.constant 1 : index
    %c0_40 = arith.constant 0 : index
    %c0_41 = arith.constant 0 : index
    %82 = vector.load %arg6[%c1, %c0_40, %c0_41] : memref<2x256x128xf32, #tpu.memory_space<vmem>>, vector<1x256x128xf32>
    %83 = vector.shape_cast %82 : vector<1x256x128xf32> to vector<256x128xf32>
    %cst_42 = arith.constant dense<0.000000e+00> : vector<8x128xf32>
    %84 = tpu.matmul %81, %83, %cst_42 {dimension_numbers = #tpu.dot_dimension_numbers<[1], [0], [0], [1], [0, 0, 1, 1], [], []>} : vector<8x256xf32>, vector<256x128xf32>, vector<8x128xf32> -> vector<8x128xf32>
    %c1_43 = arith.constant 1 : index
    %c0_44 = arith.constant 0 : index
    %c0_45 = arith.constant 0 : index
    %85 = vector.load %arg7[%c1_43, %c0_44, %c0_45] : memref<2x1x128xf32, #tpu.memory_space<vmem>>, vector<1x1x128xf32>
    %86 = vector.shape_cast %85 : vector<1x1x128xf32> to vector<1x128xf32>
    %87 = vector.broadcast %86 : vector<1x128xf32> to vector<8x128xf32>
    %88 = arith.addf %84, %87 : vector<8x128xf32>
    %c4_46 = arith.constant 4 : index
    %c0_47 = arith.constant 0 : index
    %c0_48 = arith.constant 0 : index
    %89 = vector.load %arg5[%c4_46, %c0_47, %c0_48] : memref<8x8x128xf32, #tpu.memory_space<vmem>>, vector<4x8x128xf32>
    %90 = arith.addf %78, %89 : vector<4x8x128xf32>
    %c1_49 = arith.constant 1 : index
    %c0_50 = arith.constant 0 : index
    %c0_51 = arith.constant 0 : index
    %91 = vector.load %arg8[%c1_49, %c0_50, %c0_51] : memref<2x8x128xf32, #tpu.memory_space<vmem>>, vector<1x8x128xf32>
    %92 = vector.shape_cast %91 : vector<1x8x128xf32> to vector<8x128xf32>
    %93 = vector.shape_cast %92 : vector<8x128xf32> to vector<1x8x128xf32>
    %94 = vector.broadcast %93 : vector<1x8x128xf32> to vector<4x8x128xf32>
    %95 = arith.mulf %90, %94 : vector<4x8x128xf32>
    %cst_52 = arith.constant dense<0.000000e+00> : vector<4x8xf32>
    %96 = vector.multi_reduction <add>, %95, %cst_52 [2] : vector<4x8x128xf32> to vector<4x8xf32>
    %97 = vector.shape_cast %96 : vector<4x8xf32> to vector<4x8x1xf32>
    %cst_53 = arith.constant dense<0.000000e+00> : vector<4x1xf32>
    %98 = vector.multi_reduction <add>, %97, %cst_53 [1] : vector<4x8x1xf32> to vector<4x1xf32>
    %99 = vector.shape_cast %98 : vector<4x1xf32> to vector<4x1x1xf32>
    %c1_54 = arith.constant 1 : index
    %c0_55 = arith.constant 0 : index
    %c0_56 = arith.constant 0 : index
    %100 = vector.load %arg9[%c1_54, %c0_55, %c0_56] : memref<2x1x1xf32, #tpu.memory_space<vmem>>, vector<1x1x1xf32>
    %101 = vector.shape_cast %100 : vector<1x1x1xf32> to vector<1x1xf32>
    %102 = vector.shape_cast %101 : vector<1x1xf32> to vector<1x1x1xf32>
    %103 = vector.broadcast %102 : vector<1x1x1xf32> to vector<4x1x1xf32>
    %104 = arith.addf %99, %103 : vector<4x1x1xf32>
    %cst_57 = arith.constant dense<0xFF800000> : vector<1x1xf32>
    %105 = vector.multi_reduction <maximumf>, %104, %cst_57 [0] : vector<4x1x1xf32> to vector<1x1xf32>
    %106 = vector.shape_cast %105 : vector<1x1xf32> to vector<1x1x1xf32>
    %107 = vector.broadcast %106 : vector<1x1x1xf32> to vector<4x1x1xf32>
    %108 = arith.subf %104, %107 : vector<4x1x1xf32>
    %109 = math.exp %108 : vector<4x1x1xf32>
    %cst_58 = arith.constant dense<0.000000e+00> : vector<1x1xf32>
    %110 = vector.multi_reduction <add>, %109, %cst_58 [0] : vector<4x1x1xf32> to vector<1x1xf32>
    %111 = vector.shape_cast %110 : vector<1x1xf32> to vector<1x1x1xf32>
    %112 = vector.broadcast %111 : vector<1x1x1xf32> to vector<4x1x1xf32>
    %113 = arith.divf %109, %112 : vector<4x1x1xf32>
    %114 = vector.broadcast %113 : vector<4x1x1xf32> to vector<4x8x128xf32>
    %115 = arith.mulf %90, %114 : vector<4x8x128xf32>
    %cst_59 = arith.constant dense<0.000000e+00> : vector<8x128xf32>
    %116 = vector.multi_reduction <add>, %115, %cst_59 [0] : vector<4x8x128xf32> to vector<8x128xf32>
    %117 = arith.addf %88, %116 : vector<8x128xf32>
    %118 = vector.extract_strided_slice %78 {offsets = [1, 0, 0], sizes = [3, 8, 128], strides = [1, 1, 1]} : vector<4x8x128xf32> to vector<3x8x128xf32>
    %c0_60 = arith.constant 0 : index
    %c4_61 = arith.constant 4 : index
    %c0_62 = arith.constant 0 : index
    %c0_63 = arith.constant 0 : index
    %119 = vector.load %arg11[%c0_60, %c4_61, %c0_62, %c0_63] : memref<1x8x8x128xf32, #tpu.memory_space<vmem>>, vector<1x3x8x128xf32>
    %120 = vector.shape_cast %119 : vector<1x3x8x128xf32> to vector<3x8x128xf32>
    %121 = vector.shape_cast %118 : vector<3x8x128xf32> to vector<1x3x8x128xf32>
    tpu.vector_store %arg11[%c0_60, %c4_61, %c0_62, %c0_63], %121 {strides = array<i32>} : memref<1x8x8x128xf32, #tpu.memory_space<vmem>>, vector<1x3x8x128xf32>,
    %c0_64 = arith.constant 0 : index
    %c7 = arith.constant 7 : index
    %c0_65 = arith.constant 0 : index
    %c0_66 = arith.constant 0 : index
    %122 = vector.load %arg11[%c0_64, %c7, %c0_65, %c0_66] : memref<1x8x8x128xf32, #tpu.memory_space<vmem>>, vector<1x1x8x128xf32>
    %123 = vector.shape_cast %122 : vector<1x1x8x128xf32> to vector<8x128xf32>
    %124 = vector.shape_cast %117 : vector<8x128xf32> to vector<1x1x8x128xf32>
    tpu.vector_store %arg11[%c0_64, %c7, %c0_65, %c0_66], %124 {strides = array<i32>} : memref<1x8x8x128xf32, #tpu.memory_space<vmem>>, vector<1x1x8x128xf32>,
    %c0_67 = arith.constant 0 : index
    %c0_68 = arith.constant 0 : index
    %c0_69 = arith.constant 0 : index
    %125 = vector.load %arg10[%c0_67, %c0_68, %c0_69] : memref<1x8x128xf32, #tpu.memory_space<vmem>>, vector<1x8x128xf32>
    %126 = vector.shape_cast %125 : vector<1x8x128xf32> to vector<8x128xf32>
    %127 = vector.shape_cast %117 : vector<8x128xf32> to vector<1x8x128xf32>
    tpu.vector_store %arg10[%c0_67, %c0_68, %c0_69], %127 {strides = array<i32>} : memref<1x8x128xf32, #tpu.memory_space<vmem>>, vector<1x8x128xf32>,
    return
  }
  func.func @transform_0(%arg0: i32) -> (i32, i32, i32) {
    %c0_i32 = arith.constant 0 : i32
    %c0_i32_0 = arith.constant 0 : i32
    %c0_i32_1 = arith.constant 0 : i32
    return %arg0, %c0_i32, %c0_i32_0 : i32, i32, i32
  }
  func.func @transform_1(%arg0: i32) -> (i32, i32, i32, i32) {
    %c0_i32 = arith.constant 0 : i32
    %c0_i32_0 = arith.constant 0 : i32
    %c0_i32_1 = arith.constant 0 : i32
    %c0_i32_2 = arith.constant 0 : i32
    return %arg0, %c0_i32, %c0_i32_0, %c0_i32_1 : i32, i32, i32, i32
  }
  func.func @transform_2(%arg0: i32) -> (i32, i32) {
    %c0_i32 = arith.constant 0 : i32
    %c0_i32_0 = arith.constant 0 : i32
    %c0_i32_1 = arith.constant 0 : i32
    return %c0_i32, %c0_i32_0 : i32, i32
  }
  func.func @transform_3(%arg0: i32) -> (i32, i32) {
    %c0_i32 = arith.constant 0 : i32
    %c0_i32_0 = arith.constant 0 : i32
    %c0_i32_1 = arith.constant 0 : i32
    return %c0_i32, %c0_i32_0 : i32, i32
  }
  func.func @transform_4(%arg0: i32) -> (i32, i32, i32) {
    %c0_i32 = arith.constant 0 : i32
    %c0_i32_0 = arith.constant 0 : i32
    %c0_i32_1 = arith.constant 0 : i32
    %c0_i32_2 = arith.constant 0 : i32
    return %c0_i32, %c0_i32_0, %c0_i32_1 : i32, i32, i32
  }
  func.func @transform_5(%arg0: i32) -> (i32, i32, i32) {
    %c0_i32 = arith.constant 0 : i32
    %c0_i32_0 = arith.constant 0 : i32
    %c0_i32_1 = arith.constant 0 : i32
    %c0_i32_2 = arith.constant 0 : i32
    return %c0_i32, %c0_i32_0, %c0_i32_1 : i32, i32, i32
  }
  func.func @transform_6(%arg0: i32) -> (i32, i32, i32) {
    %c0_i32 = arith.constant 0 : i32
    %c0_i32_0 = arith.constant 0 : i32
    %c0_i32_1 = arith.constant 0 : i32
    %c0_i32_2 = arith.constant 0 : i32
    return %c0_i32, %c0_i32_0, %c0_i32_1 : i32, i32, i32
  }
  func.func @transform_7(%arg0: i32) -> (i32, i32, i32) {
    %c0_i32 = arith.constant 0 : i32
    %c0_i32_0 = arith.constant 0 : i32
    %c0_i32_1 = arith.constant 0 : i32
    %c0_i32_2 = arith.constant 0 : i32
    return %c0_i32, %c0_i32_0, %c0_i32_1 : i32, i32, i32
  }
  func.func @transform_8(%arg0: i32) -> (i32, i32, i32) {
    %c0_i32 = arith.constant 0 : i32
    %c0_i32_0 = arith.constant 0 : i32
    %c0_i32_1 = arith.constant 0 : i32
    %c0_i32_2 = arith.constant 0 : i32
    return %c0_i32, %c0_i32_0, %c0_i32_1 : i32, i32, i32
  }
  func.func @transform_9(%arg0: i32) -> (i32, i32, i32) {
    %c0_i32 = arith.constant 0 : i32
    %c0_i32_0 = arith.constant 0 : i32
    %c0_i32_1 = arith.constant 0 : i32
    return %arg0, %c0_i32, %c0_i32_0 : i32, i32, i32
  }
  func.func @transform_10(%arg0: i32) -> (i32, i32, i32, i32) {
    %c0_i32 = arith.constant 0 : i32
    %c0_i32_0 = arith.constant 0 : i32
    %c0_i32_1 = arith.constant 0 : i32
    %c0_i32_2 = arith.constant 0 : i32
    return %arg0, %c0_i32, %c0_i32_0, %c0_i32_1 : i32, i32, i32, i32
  }
}

</mosaic_0001>

<bundles_post_ra>
// kernel: tpu_custom_call.1
= control target key start
LH: loop header
LB: loop body
LE: loop exit
PB: predicated region body
PF: predicated region fallthrough
CT: control target
= control target key end

     0   :  { %s1781_s0 = inlined_call_operand.vmem [shape: f32[2,8,4], index: 0, kind: input, shape index: {}]   ;;  %s1782_s1 = inlined_call_operand.hbm [shape: f32[2,8,8,128], index: 1, kind: input, shape index: {}]   ;;  %s1783_s2 = inlined_call_operand.vmem [shape: f32[4,128], index: 2, kind: input, shape index: {}]   ;;  %s1784_s3 = inlined_call_operand.vmem [shape: f32[1,128], index: 3, kind: input, shape index: {}]   ;;  %s1785_s4 = inlined_call_operand.hbm [shape: f32[8,8,128], index: 4, kind: input, shape index: {}]   ;;  %s1786_s5 = inlined_call_operand.hbm [shape: f32[2,256,128], index: 5, kind: input, shape index: {}]   ;;  %s1787_s6 = inlined_call_operand.vmem [shape: f32[2,1,128], index: 6, kind: input, shape index: {}]   ;;  %s1788_s7 = inlined_call_operand.vmem [shape: f32[2,8,128], index: 7, kind: input, shape index: {}]   ;;  %s1789_s8 = inlined_call_operand.vmem [shape: f32[2,1,1], index: 8, kind: input, shape index: {}]   ;;  %s1790_s9 = inlined_call_operand.hbm [shape: f32[2,8,128], index: 9, kind: output, shape index: {0}]   ;;  %s1791_s10 = inlined_call_operand.hbm [shape: f32[2,8,8,128], index: 10, kind: output, shape index: {1}]  }
   0x1   :  { %1795 = sst [smem:[#allocation17_spill]] %s1785_s4 }
   0x2   :  { %1796 = sst [smem:[#allocation18_spill]] %s1786_s5 }
   0x3   :  { %16 = vsyncpa [#allocation3], 0 }
   0x4   :  { %18 = vsyncpa [#allocation3 + $0x1], 0 }
   0x5   :  { %19 = vsyncpa [#allocation6], 0 }
   0x6   :  { %20 = vsyncpa [#allocation4], 0 }
   0x7   :  { %22 = vsyncpa [#allocation4 + $0x1], 0 }
   0x8   :  { %23 = vsyncpa [#allocation10], 0 }
   0x9   :  { %25 = vsyncpa [#allocation10 + $0x1], 0  ;;  %s1488_s13 = smov 0   ;;  %s1490_s14 = smov 0  }
   0xa   :  { %s1492_s15 = smov 0   ;;  %s1494_s16 = smov 0  }
   0xb LB: > { %1797 = sst [smem:[#allocation15_spill]] %s1417_s15  ;;  %s1509_s17 = sadd.s32 4294967295, %s1421_s16   ;;  %s1421_s16 = sphi %s1494_s16, %s1815_s16   ;;  %s1417_s15 = sphi %s1492_s15, %s1812_s15   ;;  %s1413_s14 = sphi %s1490_s14, %s1814_s14   ;;  %s1409_s13 = sphi %s1488_s13, %s1813_s13  }
   0xc   : > { %s1083_s18 = sadd.s32 4294967294, %s1421_s16   ;;  %p77_p0 = scmp.ne.s32.totalorder %s1413_s14, %s1409_s13 }
   0xd   : > { %p78_p1 = scmp.eq.s32.totalorder %s1509_s17, 0  ;;  %p248_p2 = scmp.eq.s32.totalorder %s1509_s17, 1 }
   0xe   : > { %p254_p3 = scmp.eq.s32.totalorder %s1083_s18, 1  ;;  %p1084_p5 = scmp.ge.s32.totalorder %s1421_s16, 1 }
   0xf   : > { %p1518_p4 = por %p78_p1, %p77_p0  ;;  %p287_p7 = scmp.lt.s32.totalorder %s1421_s16, 3 }
  0x10   : > { %p1523_p6 = por %p254_p3, %p77_p0  ;;  %s1800_s4 = sld [smem:[#allocation17_spill]] }
  0x11   : > { %p1531_p8 = pnand %p1084_p5, %p287_p7  ;;  %s1423_s25 = smov [#allocation5]  }
  0x12   : > { %s306_s26 = sshll.u32 %s1423_s25, 4  ;;  %s1802_s5 = sld [smem:[#allocation18_spill]]  ;;  %s307_s26 = int_to_ptr.vmem [resolvable:$true] %s306_s26 }
  0x13   : > { %p1133_p9 = pneg %p1531_p8  ;;  %s1792_s30 = smov 128  }
  0x14   : > { %s1793_s11 = smov 8   ;;  %s1426_s12 = smov [#allocation7]  }
  0x15   : > { %p1134_p10 = pnand %p1133_p9, %p78_p1  ;;  %s320_s18 = sshll.u32 %s1426_s12, 4  ;;  %s321_s18 = int_to_ptr.vmem [resolvable:$true] %s320_s18 }
  0x16   : > { %s304_s23 = sshll.u32 %s1800_s4, 4  ;;  %s1550_s21 = sadd.s32 1, %s1421_s16   ;;  %s305_s23 = int_to_ptr.hbm [resolvable:$true] %s304_s23 }
  0x17   : > { %1136 = dma.hbm_to_vmem [thread:$0]  (!%p1134_p10), %s305_s23, 1024, %s307_s26, [#allocation6], %s1792_s30, %s1792_s30, %s1793_s11  }
  0x18   : > { %s318_s29 = sshll.u32 %s1802_s5, 4  ;;  %s64_s22 = sadd.s32 1, %s1417_s15  ;;  %s319_s29 = int_to_ptr.hbm [resolvable:$true] %s318_s29 }
  0x19   : > { %1139 = dma.hbm_to_vmem [thread:$0]  (!%p1134_p10), %s319_s29, 8192, %s321_s18, [#allocation6], %s1792_s30, %s1792_s30, %s1793_s11  }
  0x1a   : > { %s61_s25 = ssub.s32 %s1421_s16, %s1550_s21  ;;  %p71_p12 = scmp.ne.s32.totalorder %s1417_s15, %s1413_s14 }
  0x1b   : > { %p62_p13 = scmp.eq.s32.totalorder %s61_s25, 0  ;;  %p72_p0 = scmp.eq.s32.totalorder %s1421_s16, 0 }
  0x1c   : > { %p1560_p3 = por %p248_p2, %p71_p12  ;;  %p1153_p5 = scmp.lt.s32.totalorder %s1421_s16, 2 }
  0x1d   : > { %s1566_s23 = scalar_select %p62_p13, %s1417_s15, %s64_s22  }
  0x1e   : > { %p73_p7 = por %p72_p0, %p71_p12  ;;  %s350_s26 = sand.u32 1, %s1417_s15  }
  0x1f   : > { %1804 = sst [smem:[#allocation16_spill]] %s1566_s23  ;;  %s1088_s28 = sshll.u32 %s350_s26, 6 }
  0x20   : > { %s1117_s29 = sshll.u32 %s1421_s16, 6  ;;  %s354_s11 = scalar_lea.vmem [#allocation2], %s1088_s28 }
  0x21   : > { %s359_s30 = scalar_lea.hbm %s1782_s1, %s1117_s29  ;;  %s362_s4 = sshll.u32 %s354_s11, 4  ;;  %s363_s4 = int_to_ptr.vmem [resolvable:$true] %s362_s4 }
  0x22   : > { %s360_s25 = sshll.u32 %s359_s30, 4  ;;  %p1573_p2 = pnand %p1153_p5, %p73_p7  ;;  %s361_s25 = int_to_ptr.hbm [resolvable:$true] %s360_s25 }
  0x23   : > { %s351_s22 = scalar_lea.sflag [#allocation3], %s350_s26  ;;  %s1289_s23 = sshra.s32 %s361_s25, 4  ;;  %s1290_s23 = int_to_ptr.hbm [resolvable:$true] %s1289_s23 }
  0x24   : > { %s1291_s15 = scalar_lea.hbm %s1290_s23, 64  ;;  %p1293_p10 = pneg %p1573_p2 }
  0x25   : > { %p1292_p9 = scmp.ne.s32.totalorder %s1290_s23, %s1291_s15  ;;  %s1296_s30 = scalar_lea.hbm %s1782_s1, 128 }
  0x26   : > { %p1297_p0 = scmp.lt.s32.totalorder %s1290_s23, %s1782_s1  ;;  %p1298_p5 = scmp.lt.s32.totalorder %s1296_s30, %s1291_s15 }
  0x27   : > { %p1294_p12 = pnand %p1293_p10, %p1292_p9 }
  0x28   : > { %p1299_p7 = por %p1298_p5, %p1297_p0 }
  0x29   : > { %p1295_p13 = pneg %p1294_p12 }
  0x2b   : > { %p1300_p11 = pnand %p1299_p7, %p1295_p13 }
  0x2d   : > { %1303 = shalt.err (!%p1300_p11)
}
  0x2e   : > { %s1806_s26 = smov 8   ;;  %s1807_s18 = smov 128  }
  0x2f   : > { %1143 = dma.hbm_to_vmem [thread:$0]  (!%p1573_p2), %s361_s25, 1024, %s363_s4, %s351_s22, %s1807_s18, %s1807_s18, %s1806_s26  }
  0x30   : > { %374 = sbr.rel (%p1531_p8) target bundleno = 670 (0x29e), region = 56  ;;  %s1593_s29 = sand.u32 (!%p1531_p8), 1, %s1413_s14  }
  0x31   : > { %s1092_s23 = sshll.u32 (!%p1531_p8), %s1593_s29, 6  ;;  %s377_s15 = scalar_lea.sflag (!%p1531_p8), [#allocation3], %s1593_s29 }
  0x32   : > { %s1597_s28 = scalar_lea.vmem (!%p1531_p8), [#allocation2], %s1092_s23 }
  0x35   : > { %1392 = dma.done.wait (%p1518_p4), %s377_s15, 1024  }
  0x36   : > { %1394 = vsyncadd (%p1518_p4), %s377_s15, 4294966272 }
  0x37   : > { %1396 = dma.done.wait (%p78_p1), [#allocation6], 9216  }
  0x38   : > { %1398 = vsyncadd (%p78_p1), [#allocation6], 4294958080  ;;  %p437_p8 = scmp.lt.s32.totalorder %s1509_s17, 1  ;;  %v1427_v0 = vmov 2   ;;  %v1428_v1 = vmov 0   ;;  %v476_v3 = vld [vmem:[%s1597_s28] sm:$0xff] }
  0x39   : > { %1201 = vset.pattern.permute.xlu1 %v1427_v0  ;;  %1199 = vset.pattern.permute.xlu0 %v1428_v1  ;;  %v556_v4 = vld [vmem:[#allocation5] sm:$0xff]  ;;  %v477_v7 = vld [vmem:[%s1597_s28 + $0x8] sm:$0xff]  ;;  %s1619_s11 = scalar_lea.vmem [#allocation9], %s1092_s23  ;;  %v1623_v9 = vld [vmem:[%s1597_s28 + $0x18] sm:$0xff]  ;;  %v1429_v13 = vmov 3   ;;  %v1430_v14 = vmov 1  }
  0x3a   : > { %s438_s4 = scalar_select %p437_p8, %s1509_s17, 1  ;;  %1204 = vset.pattern.permute.xlu2 %v1428_v1  ;;  %v1613_v5 = vadd.f32 %v556_v4, %v476_v3  ;;  %v564_v6 = vld [vmem:[%s1788_s7] sm:$0xff]  ;;  %v557_v8 = vld [vmem:[#allocation5 + $0x8] sm:$0xff]  ;;  %687 = vst [vmem:[%s1619_s11] sm:$0xff] %v477_v7  ;;  %v478_v11 = vld [vmem:[%s1597_s28 + $0x10] sm:$0xff]  ;;  %vm629_vm1 = vcmask 0  }
  0x3b   : > { %689 = vst [vmem:[%s1619_s11 + $0x10] sm:$0xff] %v1623_v9  ;;  %v1630_v12 = vadd.f32 %v557_v8, %v477_v7  ;;  %v559_v16 = vld [vmem:[#allocation5 + $0x18] sm:$0xff]  ;;  %v494_v20 = vld [vmem:[#allocation7 + $0x70] sm:$0xff]  ;;  %v493_v23 = vld [vmem:[#allocation7 + $0x68] sm:$0xff]  ;;  %s1095_s26 = sshll.u32 %s1593_s29, 3  ;;  %s1112_s18 = sshll.u32 %s1509_s17, 3 }
  0x3c   : > { %s1097_s5 = sshll.u32 %s438_s4, 3  ;;  %v565_v10 = vmul.f32 %v564_v6, %v1613_v5  ;;  %688 = vst [vmem:[%s1619_s11 + $0x8] sm:$0xff] %v478_v11  ;;  %v1634_v17 = vadd.f32 %v559_v16, %v1623_v9  ;;  %v495_v19 = vld [vmem:[#allocation7 + $0x78] sm:$0xff]  ;;  %v510_v22 = vld [vmem:[#allocation7 + $0xf0] sm:$0xff]  ;;  %v509_v24 = vld [vmem:[#allocation7 + $0xe8] sm:$0xff]  ;;  %s1118_s23 = sshll.u32 %s1509_s17, 6 }
  0x3d   : > { %s440_s25 = scalar_lea.vmem %s1781_s0, %s1097_s5  ;;  %v566_v15 = vmul.f32 %v564_v6, %v1630_v12  ;;  %v511_v21 = vld [vmem:[#allocation7 + $0xf8] sm:$0xff]  ;;  %516 = vmatpush.msra.mxu0 %v495_v19  ;;  %v492_v25 = vld [vmem:[#allocation7 + $0x60] sm:$0xff]  ;;  %v490_v29 = vld [vmem:[#allocation7 + $0x50] sm:$0xff]  ;;  %s927_s5 = scalar_lea.hbm %s1790_s9, %s1112_s18 }
  0x3e   : > { %v441_v2 = vld [vmem:[%s440_s25] sm:$0xff]  ;;  %569 = vadd.xlane.f32.xlu2 %v565_v10  ;;  %v568_v18 = vmul.f32 %v564_v6, %v1634_v17  ;;  %536 = vmatpush.msra.mxu1 %v511_v21  ;;  %v491_v27 = vld [vmem:[#allocation7 + $0x58] sm:$0xff]  ;;  %v506_v30 = vld [vmem:[#allocation7 + $0xd0] sm:$0xff]  ;;  %s943_s19 = sshll.u32 %s1619_s11, 4  ;;  %s942_s25 = scalar_lea.hbm %s1791_s10, %s1118_s23  ;;  %s1733_s19 = int_to_ptr.vmem [resolvable:$true] %s943_s19 }
  0x3f   : > { %463 = vperm.xlu1 %1201, %v441_v2   ;;  %446 = vperm.xlu0 %1199, %v441_v2   ;;  %v508_v26 = vld [vmem:[#allocation7 + $0xe0] sm:$0xff]  ;;  %v507_v28 = vld [vmem:[#allocation7 + $0xd8] sm:$0xff]  ;;  %v489_v31 = vld [vmem:[#allocation7 + $0x48] sm:$0xff]  ;;  %s429_s17 = scalar_lea.vmem [#allocation8], %s1095_s26  ;;  %s931_s30 = sshll.u32 %s927_s5, 4  ;;  %s932_s30 = int_to_ptr.hbm [resolvable:$true] %s931_s30 }
  0x40   : > { %517 = vmatpush.msra.mxu0 %v494_v20  ;;  %537 = vmatpush.msra.mxu1 %v510_v22  ;;  %v558_v32 = vld [vmem:[#allocation5 + $0x10] sm:$0xff]  ;;  %v488_v35 = vld [vmem:[#allocation7 + $0x40] sm:$0xff]  ;;  %v505_v36 = vld [vmem:[#allocation7 + $0xc8] sm:$0xff]  ;;  %s929_s22 = sshll.u32 %s429_s17, 4  ;;  %s945_s12 = sshll.u32 %s942_s25, 4  ;;  %s930_s22 = int_to_ptr.vmem [resolvable:$true] %s929_s22  ;;  %s1736_s12 = int_to_ptr.hbm [resolvable:$true] %s945_s12 }
  0x41   : > { %v1637_v33 = vadd.f32 %v558_v32, %v478_v11  ;;  %v487_v37 = vld [vmem:[#allocation7 + $0x38] sm:$0xff]  ;;  %v504_v38 = vld [vmem:[#allocation7 + $0xc0] sm:$0xff]  ;;  %v486_v39 = vld [vmem:[#allocation7 + $0x30] sm:$0xff]  ;;  %s912_s18 = scalar_lea.sflag [#allocation4], %s1593_s29  ;;  %s1333_s15 = sshra.s32 %s932_s30, 4  ;;  %s1334_s15 = int_to_ptr.hbm [resolvable:$true] %s1333_s15 }
  0x42   : > { %518 = vmatpush.msra.mxu0 %v493_v23  ;;  %538 = vmatpush.msra.mxu1 %v509_v24  ;;  %v503_v40 = vld [vmem:[#allocation7 + $0xb8] sm:$0xff]  ;;  %v485_v41 = vld [vmem:[#allocation7 + $0x28] sm:$0xff]  ;;  %v502_v42 = vld [vmem:[#allocation7 + $0xb0] sm:$0xff]  ;;  %s1335_s23 = scalar_lea.hbm %s1334_s15, 8  ;;  %s1339_s5 = scalar_lea.hbm %s1790_s9, 16 }
  0x43   : > { %v567_v34 = vmul.f32 %v564_v6, %v1637_v33  ;;  %v484_v43 = vld [vmem:[#allocation7 + $0x20] sm:$0xff]  ;;  %v501_v44 = vld [vmem:[#allocation7 + $0xa8] sm:$0xff]  ;;  %v483_v45 = vld [vmem:[#allocation7 + $0x18] sm:$0xff]  ;;  %p1336_p1 = scmp.ne.s32.totalorder %s1334_s15, %s1335_s23  ;;  %p1340_p2 = scmp.lt.s32.totalorder %s1334_s15, %s1790_s9 }
  0x44   : > { %519 = vmatpush.msra.mxu0 %v492_v25  ;;  %539 = vmatpush.msra.mxu1 %v508_v26  ;;  %v500_v46 = vld [vmem:[#allocation7 + $0xa0] sm:$0xff]  ;;  %v482_v47 = vld [vmem:[#allocation7 + $0x10] sm:$0xff]  ;;  %v499_v48 = vld [vmem:[#allocation7 + $0x98] sm:$0xff]  ;;  %p1341_p9 = scmp.lt.s32.totalorder %s1339_s5, %s1335_s23 }
  0x45   : > { %v481_v49 = vld [vmem:[#allocation7 + $0x8] sm:$0xff]  ;;  %v498_v50 = vld [vmem:[#allocation7 + $0x90] sm:$0xff]  ;;  %v480_v51 = vld [vmem:[#allocation7] sm:$0xff]  ;;  %p1337_p4 = pnand %p1336_p1, %p1560_p3 }
  0x46   : > { %571 = vadd.xlane.f32.xlu2 %v566_v15  ;;  %520 = vmatpush.msra.mxu0 %v491_v27  ;;  %v497_v52 = vld [vmem:[#allocation7 + $0x88] sm:$0xff]  ;;  %v496_v53 = vld [vmem:[#allocation7 + $0x80] sm:$0xff]  ;;  %p1342_p10 = por %p1341_p9, %p1340_p2 }
  0x47   : > { %1202 = vset.pattern.permute.xlu1 %v1429_v13  ;;  %1200 = vset.pattern.permute.xlu0 %v1430_v14  ;;  %v442_v54 = vld [vmem:[%s1783_s2] sm:$0xf]  ;;  %p1338_p11 = pneg %p1337_p4 }
  0x48   : > { %470 = vperm.xlu1 %1202, %v441_v2   ;;  %456 = vperm.xlu0 %1200, %v441_v2   ;;  %v449_v55 = vperm.slane %v442_v54, 0  ;;  %v1206_v58 = vld [vmem:[%s1784_s3] ss:$0 sm:$0xff]  ;;  %v459_v60 = vperm.slane %v442_v54, 1  ;;  %v466_v61 = vperm.slane %v442_v54, 2  ;;  %v473_v0 = vperm.slane %v442_v54, 3 }
  0x49   : > { %540 = vmatpush.msra.mxu1 %v507_v28  ;;  %521 = vmatpush.msra.mxu0 %v490_v29  ;;  %p1343_p12 = pnand %p1342_p10, %p1338_p11 }
  0x4b   : > { %541 = vmatpush.msra.mxu1 %v506_v30  ;;  %522 = vmatpush.msra.mxu0 %v489_v31 }
  0x4d   : > { %523 = vmatpush.msra.mxu0 %v488_v35  ;;  %542 = vmatpush.msra.mxu1 %v505_v36  ;;  %v601_v36 = vld [vmem:[%s1789_s8] sm:$0x1] }
  0x4e   : > { %575 = vadd.xlane.f32.xlu2 %v568_v18 }
  0x4f   : > { %524 = vmatpush.msra.mxu0 %v487_v37  ;;  %543 = vmatpush.msra.mxu1 %v504_v38  ;;  %v606_v37 = vlaneseq }
  0x50   : > { %1203 = vset.pattern.permute.xlu0 %v1428_v1  ;;  %1205 = vset.pattern.permute.xlu1 %v1428_v1 }
  0x51   : > { %525 = vmatpush.msra.mxu0 %v486_v39  ;;  %544 = vmatpush.msra.mxu1 %v503_v40  ;;  %vm1650_vm0 = vcmp.lt.s32.totalorder %v606_v37, 1 }
  0x53   : > { %526 = vmatpush.msra.mxu0 %v485_v41  ;;  %545 = vmatpush.msra.mxu1 %v502_v42 }
  0x55   : > { %527 = vmatpush.msra.mxu0 %v484_v43  ;;  %546 = vmatpush.msra.mxu1 %v501_v44 }
  0x57   : > { %528 = vmatpush.msra.mxu0 %v483_v45  ;;  %547 = vmatpush.msra.mxu1 %v500_v46 }
  0x59   : > { %529 = vmatpush.msra.mxu0 %v482_v47  ;;  %548 = vmatpush.msra.mxu1 %v499_v48 }
  0x5b   : > { %530 = vmatpush.msra.mxu0 %v481_v49  ;;  %549 = vmatpush.msra.mxu1 %v498_v50 }
  0x5d   : > { %531 = vmatpush.msra.mxu0 %v480_v51  ;;  %550 = vmatpush.msra.mxu1 %v497_v52 }
  0x5f   : > { %551 = vmatpush.msra.mxu1 %v496_v53 }
  0x60   : > { %552 = vmatmul.f32.vlgmr.msra.gmra.mxu1 %v1623_v9 }
  0x72   : > { %573 = vadd.xlane.f32.xlu1 %v567_v34 }
  0xb1   : > { %v447_v56 = vpop.permute.xlu0 %446  ;;  %v464_v57 = vpop.permute.xlu1 %463 }
  0xb2   : > { %v450_v59 = vmul.f32 %v449_v55, %v447_v56  ;;  %v467_v3 = vmul.f32 %v466_v61, %v464_v57  ;;  %v570_v9 = vpop.xlane.xlu2 %569 }
  0xb3   : > { %v577_v13 = vrot.slane %v570_v9, 4 }
  0xb4   : > { %v454_v62 = vadd.f32 %v1206_v58, %v450_v59 }
  0xb5   : > { %v578_v16 = vadd.f32 %v577_v13, %v570_v9 }
  0xb7   : > { %v579_v20 = vrot.slane %v578_v16, 2 }
  0xb9   : > { %v580_v23 = vadd.f32 %v579_v20, %v578_v16 }
  0xba   : > { %v457_v63 = vpop.permute.xlu0 %456  ;;  %v471_v2 = vpop.permute.xlu1 %470 }
  0xbb   : > { %v460_v1 = vmul.f32 %v459_v60, %v457_v63  ;;  %v474_v6 = vmul.f32 %v473_v0, %v471_v2  ;;  %v572_v10 = vpop.xlane.xlu2 %571  ;;  %v581_v27 = vrot.slane %v580_v23, 1 }
  0xbc   : > { %v583_v14 = vrot.slane %v572_v10, 4 }
  0xbd   : > { %v461_v4 = vadd.f32 %v460_v1, %v454_v62  ;;  %v582_v32 = vadd.f32 %v581_v27, %v580_v23  ;;  %v778_v27 = vld [vmem:[#allocation5 + $0x30] sm:$0xff] }
  0xbe   : > { %v584_v18 = vadd.f32 %v583_v14, %v572_v10 }
  0xbf   : > { %v468_v7 = vadd.f32 %v467_v3, %v461_v4  ;;  %v602_v40 = vadd.f32 %v601_v36, %v582_v32 }
  0xc0   : > { %v585_v21 = vrot.slane %v584_v18, 2 }
  0xc1   : > { %v475_v8 = vadd.f32 %v474_v6, %v468_v7  ;;  %v610_v46 = vsel %vm1650_vm0, %v602_v40, -inf }
  0xc2   : > { %v586_v24 = vadd.f32 %v585_v21, %v584_v18 }
  0xc3   : > { %532 = vmatmul.f32.vlgmr.msra.gmra.mxu0 %v475_v8  ;;  %v576_v11 = vpop.xlane.xlu2 %575 }
  0xc4   : > { %v595_v15 = vrot.slane %v576_v11, 4  ;;  %v587_v28 = vrot.slane %v586_v24, 1 }
  0xc6   : > { %v596_v19 = vadd.f32 %v595_v15, %v576_v11  ;;  %v588_v34 = vadd.f32 %v587_v28, %v586_v24 }
  0xc8   : > { %v597_v22 = vrot.slane %v596_v19, 2  ;;  %v603_v41 = vadd.f32 %v601_v36, %v588_v34 }
  0xca   : > { %v598_v25 = vadd.f32 %v597_v22, %v596_v19  ;;  %v611_v47 = vsel %vm1650_vm0, %v603_v41, -inf }
  0xcb   : > { %v614_v51 = vmax.f32 %v610_v46, %v611_v47  ;;  %v777_v46 = vld [vmem:[#allocation5 + $0x28] sm:$0xff] }
  0xcc   : > { %v599_v30 = vrot.slane %v598_v25, 1 }
  0xce   : > { %v600_v38 = vadd.f32 %v599_v30, %v598_v25  ;;  %v1674_v30 = vld [vmem:[%s1597_s28 + $0x38] sm:$0xff] }
  0xcf   : > { %1108 = vst [vmem:[%s1619_s11 + $0x30] sm:$0xff] %v1674_v30 }
  0xd0   : > { %v605_v44 = vadd.f32 %v601_v36, %v600_v38  ;;  %v1100_v38 = vld [vmem:[%s1597_s28 + $0x28] sm:$0xff] }
  0xd1   : > { %1106 = vst [vmem:[%s1619_s11 + $0x20] sm:$0xff] %v1100_v38  ;;  %v1689_v47 = vadd.f32 %v1100_v38, %v777_v46 }
  0xd2   : > { %v613_v49 = vsel %vm1650_vm0, %v605_v44, -inf }
  0xe5   : > { %v574_v26 = vpop.xlane.xlu1 %573 }
  0xe6   : > { %v589_v29 = vrot.slane %v574_v26, 4 }
  0xe8   : > { %v590_v31 = vadd.f32 %v589_v29, %v574_v26  ;;  %v1101_v26 = vld [vmem:[%s1597_s28 + $0x30] sm:$0xff]  ;;  %v1104_v29 = vld [vmem:[%s1788_s7 + $0x8] sm:$0xff] }
  0xe9   : > { %v1667_v28 = vadd.f32 %v1101_v26, %v778_v27  ;;  %1107 = vst [vmem:[%s1619_s11 + $0x28] sm:$0xff] %v1101_v26 }
  0xea   : > { %v591_v35 = vrot.slane %v590_v31, 2 }
  0xeb   : > { %v788_v34 = vmul.f32 %v1104_v29, %v1667_v28 }
  0xec   : > { %v592_v39 = vadd.f32 %v591_v35, %v590_v31  ;;  %v779_v31 = vld [vmem:[#allocation5 + $0x38] sm:$0xff] }
  0xed   : > { %794 = vadd.xlane.f32.xlu1 %v788_v34  ;;  %v1680_v35 = vadd.f32 %v1674_v30, %v779_v31 }
  0xee   : > { %v593_v42 = vrot.slane %v592_v39, 1 }
  0xef   : > { %v789_v37 = vmul.f32 %v1104_v29, %v1680_v35 }
  0xf0   : > { %v594_v45 = vadd.f32 %v593_v42, %v592_v39  ;;  %v776_v42 = vld [vmem:[#allocation5 + $0x20] sm:$0xff] }
  0xf2   : > { %v604_v48 = vadd.f32 %v601_v36, %v594_v45 }
  0xf4   : > { %v612_v50 = vsel %vm1650_vm0, %v604_v48, -inf }
  0xf5   : > { %v615_v52 = vmax.f32 %v612_v50, %v613_v49  ;;  %796 = vadd.xlane.f32.xlu1 %v789_v37  ;;  %v713_v49 = vld [vmem:[#allocation7 + $0x178] sm:$0xff]  ;;  %v712_v50 = vld [vmem:[#allocation7 + $0x170] sm:$0xff] }
  0xf6   : > { %735 = vmatpush.msra.mxu2 %v713_v49 }
  0xf7   : > { %v616_v53 = vmax.f32 %v614_v51, %v615_v52  ;;  %v729_v51 = vld [vmem:[#allocation7 + $0x1f8] sm:$0xff]  ;;  %v728_v52 = vld [vmem:[#allocation7 + $0x1f0] sm:$0xff] }
  0xf8   : > { %755 = vmatpush.msra.mxu3 %v729_v51  ;;  %736 = vmatpush.msra.mxu2 %v712_v50 }
  0xf9   : > { %v617_v54 = vsub.f32 %v602_v40, %v616_v53  ;;  %v619_v55 = vsub.f32 %v604_v48, %v616_v53  ;;  %v618_v56 = vsub.f32 %v603_v41, %v616_v53  ;;  %v620_v57 = vsub.f32 %v605_v44, %v616_v53  ;;  %v1099_v41 = vld [vmem:[%s1597_s28 + $0x20] sm:$0xff]  ;;  %v711_v53 = vld [vmem:[#allocation7 + $0x168] sm:$0xff] }
  0xfa   : > { %v1686_v44 = vadd.f32 %v1099_v41, %v776_v42  ;;  %v787_v48 = vmul.f32 %v1104_v29, %v1689_v47  ;;  %756 = vmatpush.msra.mxu3 %v728_v52  ;;  %737 = vmatpush.msra.mxu2 %v711_v53 }
  0xfb   : > { %v621_v58 = vmul.f32 1.442695, %v617_v54  ;;  %v625_v59 = vmul.f32 1.442695, %v619_v55  ;;  %v623_v60 = vmul.f32 1.442695, %v618_v56 }
  0xfc   : > { %v627_v61 = vmul.f32 1.442695, %v620_v57  ;;  %v786_v45 = vmul.f32 %v1104_v29, %v1686_v44  ;;  %v727_v54 = vld [vmem:[#allocation7 + $0x1e8] sm:$0xff]  ;;  %v710_v55 = vld [vmem:[#allocation7 + $0x160] sm:$0xff]  ;;  %v709_v57 = vld [vmem:[#allocation7 + $0x158] sm:$0xff] }
  0xfd   : > { %1209 = vpow2.f32 %v621_v58  ;;  %v726_v56 = vld [vmem:[#allocation7 + $0x1e0] sm:$0xff]  ;;  %757 = vmatpush.msra.mxu3 %v727_v54  ;;  %738 = vmatpush.msra.mxu2 %v710_v55  ;;  %v708_v58 = vld [vmem:[#allocation7 + $0x150] sm:$0xff] }
  0xfe   : > { %1211 = vpow2.f32 %v625_v59  ;;  %v725_v59 = vld [vmem:[#allocation7 + $0x1d8] sm:$0xff] }
  0xff   : > { %1213 = vpow2.f32 %v623_v60  ;;  %758 = vmatpush.msra.mxu3 %v726_v56  ;;  %739 = vmatpush.msra.mxu2 %v709_v57  ;;  %v707_v60 = vld [vmem:[#allocation7 + $0x148] sm:$0xff] }
 0x100   : > { %1215 = vpow2.f32 %v627_v61  ;;  %v724_v61 = vld [vmem:[#allocation7 + $0x1d0] sm:$0xff] }
 0x101   : > { %740 = vmatpush.msra.mxu2 %v708_v58  ;;  %759 = vmatpush.msra.mxu3 %v725_v59 }
 0x103   : > { %v1210_v62 = vpop.eup %1209  ;;  %741 = vmatpush.msra.mxu2 %v707_v60  ;;  %760 = vmatpush.msra.mxu3 %v724_v61 }
 0x104   : > { %v1212_v63 = vpop.eup %1211  ;;  %v630_v0 = vsel %vm629_vm1, %v1210_v62, 0.0 }
 0x105   : > { %v1214_v1 = vpop.eup %1213  ;;  %v633_v6 = vsel %vm629_vm1, %v1212_v63, 0.0 }
 0x106   : > { %v631_v2 = vsel %vm629_vm1, %v1214_v1, 0.0  ;;  %v1216_v3 = vpop.eup %1215 }
 0x107   : > { %v632_v4 = vadd.f32 %v631_v2, %v630_v0  ;;  %v635_v8 = vsel %vm629_vm1, %v1216_v3, 0.0  ;;  %v705_v0 = vld [vmem:[#allocation7 + $0x138] sm:$0xff]  ;;  %v704_v2 = vld [vmem:[#allocation7 + $0x130] sm:$0xff] }
 0x109   : > { %v634_v7 = vadd.f32 %v633_v6, %v632_v4  ;;  %v703_v4 = vld [vmem:[#allocation7 + $0x128] sm:$0xff]  ;;  %v720_v6 = vld [vmem:[#allocation7 + $0x1b0] sm:$0xff] }
 0x10b   : > { %v636_v9 = vadd.f32 %v635_v8, %v634_v7  ;;  %v702_v7 = vld [vmem:[#allocation7 + $0x120] sm:$0xff]  ;;  %v719_v8 = vld [vmem:[#allocation7 + $0x1a8] sm:$0xff] }
 0x10d   : > { %1217 = vrcp.f32 %v636_v9  ;;  %v648_v14 = vand.u32 2147483648, %v636_v9  ;;  %v646_v16 = vand.u32 2147483647, %v636_v9  ;;  %vm642_vm3 = vweird.f32 %v636_v9 }
 0x10f   : > { %v649_v19 = vor.u32 1.1754944e-38, %v648_v14  ;;  %vm647_vm5 = vcmp.eq.f32.partialorder %v646_v16, 8.507059e+37  ;;  %v699_v14 = vld [vmem:[#allocation7 + $0x108] sm:$0xff]  ;;  %v698_v16 = vld [vmem:[#allocation7 + $0x100] sm:$0xff] }
 0x113   : > { %v1218_v10 = vpop.eup %1217 }
 0x114   : > { %v638_v11 = vmul.f32 %v1218_v10, %v636_v9  ;;  %vm643_vm2 = vweird.f32 %v1218_v10  ;;  %v701_v9 = vld [vmem:[#allocation7 + $0x118] sm:$0xff] }
 0x115   : > { %vm644_vm4 = vmor %vm642_vm3, %vm643_vm2 }
 0x116   : > { %v639_v13 = vsub.f32 1.0, %v638_v11  ;;  %v700_v11 = vld [vmem:[#allocation7 + $0x110] sm:$0xff] }
 0x118   : > { %v640_v15 = vmul.f32 %v1218_v10, %v639_v13  ;;  %v717_v13 = vld [vmem:[#allocation7 + $0x198] sm:$0xff] }
 0x11a   : > { %v641_v18 = vadd.f32 %v1218_v10, %v640_v15  ;;  %v716_v15 = vld [vmem:[#allocation7 + $0x190] sm:$0xff] }
 0x11c   : > { %v645_v20 = vsel %vm644_vm4, %v1218_v10, %v641_v18  ;;  %v718_v10 = vld [vmem:[#allocation7 + $0x1a0] sm:$0xff]  ;;  %v715_v18 = vld [vmem:[#allocation7 + $0x188] sm:$0xff] }
 0x11d   : > { %v650_v21 = vsel %vm647_vm5, %v649_v19, %v645_v20  ;;  %v714_v19 = vld [vmem:[#allocation7 + $0x180] sm:$0xff] }
 0x11e   : > { %v652_v22 = vmul.f32 %v1214_v1, %v650_v21  ;;  %v651_v23 = vmul.f32 %v1210_v62, %v650_v21  ;;  %v653_v32 = vmul.f32 %v1212_v63, %v650_v21  ;;  %v654_v39 = vmul.f32 %v1216_v3, %v650_v21  ;;  %v706_v62 = vld [vmem:[#allocation7 + $0x140] sm:$0xff]  ;;  %v723_v63 = vld [vmem:[#allocation7 + $0x1c8] sm:$0xff]  ;;  %v721_v3 = vld [vmem:[#allocation7 + $0x1b8] sm:$0xff] }
 0x11f   : > { %v722_v1 = vld [vmem:[#allocation7 + $0x1c0] sm:$0xff]  ;;  %742 = vmatpush.msra.mxu2 %v706_v62  ;;  %761 = vmatpush.msra.mxu3 %v723_v63 }
 0x120   : > { %v660_v24 = vperm.slane %v652_v22, 0  ;;  %v659_v25 = vperm.slane %v651_v23, 0  ;;  %v661_v36 = vperm.slane %v653_v32, 0  ;;  %v662_v40 = vperm.slane %v654_v39, 0  ;;  %v1207_v23 = vld [vmem:[%s1787_s6] ss:$0 sm:$0xff]  ;;  %v553_v32 = vpop.f32.mrf.mxu1 }
 0x121   : > { %743 = vmatpush.msra.mxu2 %v705_v0  ;;  %762 = vmatpush.msra.mxu3 %v722_v1  ;;  %v1105_v63 = vld [vmem:[%s1789_s8 + $0x1] sm:$0x1] }
 0x122   : > { %668 = vperm.xlu2 %1204, %v660_v24   ;;  %664 = vperm.xlu0 %1203, %v659_v25  }
 0x123   : > { %744 = vmatpush.msra.mxu2 %v704_v2  ;;  %763 = vmatpush.msra.mxu3 %v721_v3 }
 0x125   : > { %745 = vmatpush.msra.mxu2 %v703_v4  ;;  %764 = vmatpush.msra.mxu3 %v720_v6 }
 0x127   : > { %746 = vmatpush.msra.mxu2 %v702_v7  ;;  %765 = vmatpush.msra.mxu3 %v719_v8 }
 0x129   : > { %747 = vmatpush.msra.mxu2 %v701_v9  ;;  %766 = vmatpush.msra.mxu3 %v718_v10 }
 0x12a   : > { %672 = vperm.xlu0 %1203, %v661_v36  }
 0x12b   : > { %748 = vmatpush.msra.mxu2 %v700_v11  ;;  %767 = vmatpush.msra.mxu3 %v717_v13 }
 0x12d   : > { %749 = vmatpush.msra.mxu2 %v699_v14  ;;  %768 = vmatpush.msra.mxu3 %v716_v15 }
 0x12f   : > { %750 = vmatpush.msra.mxu2 %v698_v16  ;;  %769 = vmatpush.msra.mxu3 %v715_v18 }
 0x131   : > { %770 = vmatpush.msra.mxu3 %v714_v19 }
 0x132   : > { %676 = vperm.xlu0 %1203, %v662_v40   ;;  %771 = vmatmul.f32.vlgmr.msra.gmra.mxu3 %v1674_v30 }
 0x140   : > { %v533_v25 = vpop.f32.mrf.mxu0 }
 0x141   : > { %v534_v29 = vadd.f32 %v1207_v23, %v533_v25 }
 0x143   : > { %v554_v37 = vadd.f32 %v553_v32, %v534_v29 }
 0x14b   : > { %790 = vadd.xlane.f32.xlu2 %v786_v45 }
 0x15c   : > { %792 = vadd.xlane.f32.xlu0 %v787_v48 }
 0x160   : > { %v795_v40 = vpop.xlane.xlu1 %794 }
 0x161   : > { %v810_v42 = vrot.slane %v795_v40, 4 }
 0x163   : > { %v811_v46 = vadd.f32 %v810_v42, %v795_v40 }
 0x165   : > { %v812_v49 = vrot.slane %v811_v46, 2 }
 0x167   : > { %v813_v52 = vadd.f32 %v812_v49, %v811_v46 }
 0x168   : > { %v797_v41 = vpop.xlane.xlu1 %796 }
 0x169   : > { %v816_v45 = vrot.slane %v797_v41, 4  ;;  %v814_v55 = vrot.slane %v813_v52, 1 }
 0x16b   : > { %v815_v60 = vadd.f32 %v814_v55, %v813_v52 }
 0x16d   : > { %v826_v2 = vadd.f32 %v1105_v63, %v815_v60 }
 0x16f   : > { %v830_v8 = vsel %vm1650_vm0, %v826_v2, -inf }
 0x17c   : > { %v669_v22 = vpop.permute.xlu2 %668 }
 0x17d   : > { %v680_v26 = vmul.f32 %v669_v22, %v1630_v12 }
 0x194   : > { %v665_v20 = vpop.permute.xlu0 %664 }
 0x195   : > { %v679_v24 = vmul.f32 %v665_v20, %v1613_v5 }
 0x197   : > { %v683_v31 = vadd.f32 %v680_v26, %v679_v24 }
 0x19c   : > { %v673_v21 = vpop.permute.xlu0 %672 }
 0x19d   : > { %v681_v27 = vmul.f32 %v673_v21, %v1637_v33  ;;  %v817_v33 = vadd.f32 %v816_v45, %v797_v41 }
 0x19f   : > { %v684_v30 = vadd.f32 %v683_v31, %v681_v27  ;;  %v818_v50 = vrot.slane %v817_v33, 2 }
 0x1a1   : > { %v819_v53 = vadd.f32 %v818_v50, %v817_v33 }
 0x1a3   : > { %v820_v56 = vrot.slane %v819_v53, 1 }
 0x1a4   : > { %v677_v34 = vpop.permute.xlu0 %676 }
 0x1a5   : > { %v682_v36 = vmul.f32 %v677_v34, %v1634_v17  ;;  %v821_v61 = vadd.f32 %v820_v56, %v819_v53 }
 0x1a7   : > { %v685_v38 = vadd.f32 %v684_v30, %v682_v36  ;;  %v827_v3 = vadd.f32 %v1105_v63, %v821_v61 }
 0x1a9   : > { %v686_v39 = vadd.f32 %v685_v38, %v554_v37  ;;  %v831_v9 = vsel %vm1650_vm0, %v827_v3, -inf }
 0x1aa   : > { %v833_v14 = vmax.f32 %v830_v8, %v831_v9 }
 0x1ab   : > { %1098 = vst [vmem:[%s1619_s11 + $0x18] sm:$0xff] %v686_v39  ;;  %751 = vmatmul.f32.vlgmr.msra.gmra.mxu2 %v686_v39 }
 0x1be   : > { %v791_v5 = vpop.xlane.xlu2 %790 }
 0x1bf   : > { %v798_v12 = vrot.slane %v791_v5, 4 }
 0x1c1   : > { %v799_v48 = vadd.f32 %v798_v12, %v791_v5 }
 0x1c3   : > { %v800_v51 = vrot.slane %v799_v48, 2 }
 0x1c5   : > { %v801_v17 = vadd.f32 %v800_v51, %v799_v48 }
 0x1c7   : > { %v802_v58 = vrot.slane %v801_v17, 1 }
 0x1c9   : > { %v803_v0 = vadd.f32 %v802_v58, %v801_v17 }
 0x1cb   : > { %v824_v6 = vadd.f32 %v1105_v63, %v803_v0 }
 0x1cd   : > { %v828_v11 = vsel %vm1650_vm0, %v824_v6, -inf }
 0x1cf   : > { %v793_v54 = vpop.xlane.xlu0 %792 }
 0x1d0   : > { %v804_v57 = vrot.slane %v793_v54, 4 }
 0x1d2   : > { %v805_v59 = vadd.f32 %v804_v57, %v793_v54 }
 0x1d4   : > { %v806_v62 = vrot.slane %v805_v59, 2 }
 0x1d6   : > { %v807_v1 = vadd.f32 %v806_v62, %v805_v59  ;;  %v1208_v59 = vld [vmem:[%s1787_s6 + $0x1] ss:$0 sm:$0xff] }
 0x1d8   : > { %v808_v4 = vrot.slane %v807_v1, 1 }
 0x1da   : > { %v809_v7 = vadd.f32 %v808_v4, %v807_v1 }
 0x1dc   : > { %v825_v10 = vadd.f32 %v1105_v63, %v809_v7 }
 0x1de   : > { %v829_v13 = vsel %vm1650_vm0, %v825_v10, -inf }
 0x1df   : > { %v832_v15 = vmax.f32 %v828_v11, %v829_v13 }
 0x1e1   : > { %v834_v16 = vmax.f32 %v832_v15, %v833_v14 }
 0x1e3   : > { %v835_v18 = vsub.f32 %v824_v6, %v834_v16  ;;  %v836_v19 = vsub.f32 %v825_v10, %v834_v16  ;;  %v838_v20 = vsub.f32 %v827_v3, %v834_v16  ;;  %v837_v21 = vsub.f32 %v826_v2, %v834_v16 }
 0x1e5   : > { %v839_v22 = vmul.f32 1.442695, %v835_v18  ;;  %v841_v23 = vmul.f32 1.442695, %v836_v19  ;;  %v845_v24 = vmul.f32 1.442695, %v838_v20 }
 0x1e6   : > { %v843_v25 = vmul.f32 1.442695, %v837_v21 }
 0x1e7   : > { %1219 = vpow2.f32 %v839_v22 }
 0x1e8   : > { %1221 = vpow2.f32 %v841_v23 }
 0x1e9   : > { %1223 = vpow2.f32 %v845_v24 }
 0x1ea   : > { %1225 = vpow2.f32 %v843_v25 }
 0x1ed   : > { %v1220_v26 = vpop.eup %1219 }
 0x1ee   : > { %v1222_v27 = vpop.eup %1221  ;;  %v847_v43 = vsel %vm629_vm1, %v1220_v26, 0.0 }
 0x1ef   : > { %v1224_v29 = vpop.eup %1223  ;;  %v848_v31 = vsel %vm629_vm1, %v1222_v27, 0.0 }
 0x1f0   : > { %v1226_v32 = vpop.eup %1225  ;;  %v849_v34 = vadd.f32 %v848_v31, %v847_v43  ;;  %v852_v37 = vsel %vm629_vm1, %v1224_v29, 0.0 }
 0x1f1   : > { %v850_v30 = vsel %vm629_vm1, %v1226_v32, 0.0 }
 0x1f2   : > { %v851_v36 = vadd.f32 %v850_v30, %v849_v34 }
 0x1f4   : > { %v853_v38 = vadd.f32 %v852_v37, %v851_v36 }
 0x1f6   : > { %1227 = vrcp.f32 %v853_v38  ;;  %v865_v5 = vand.u32 2147483648, %v853_v38  ;;  %v863_v45 = vand.u32 2147483647, %v853_v38  ;;  %vm859_vm7 = vweird.f32 %v853_v38 }
 0x1f8   : > { %v866_v46 = vor.u32 1.1754944e-38, %v865_v5  ;;  %vm864_vm9 = vcmp.eq.f32.partialorder %v863_v45, 8.507059e+37 }
 0x1fc   : > { %v1228_v39 = vpop.eup %1227 }
 0x1fd   : > { %v855_v40 = vmul.f32 %v1228_v39, %v853_v38  ;;  %vm860_vm6 = vweird.f32 %v1228_v39 }
 0x1fe   : > { %vm861_vm8 = vmor %vm859_vm7, %vm860_vm6 }
 0x1ff   : > { %v856_v41 = vsub.f32 1.0, %v855_v40 }
 0x201   : > { %v857_v42 = vmul.f32 %v1228_v39, %v856_v41 }
 0x203   : > { %v858_v12 = vadd.f32 %v1228_v39, %v857_v42 }
 0x205   : > { %v862_v33 = vsel %vm861_vm8, %v1228_v39, %v858_v12 }
 0x206   : > { %v867_v48 = vsel %vm864_vm9, %v866_v46, %v862_v33 }
 0x207   : > { %v870_v49 = vmul.f32 %v1226_v32, %v867_v48  ;;  %v869_v50 = vmul.f32 %v1222_v27, %v867_v48  ;;  %v868_v51 = vmul.f32 %v1220_v26, %v867_v48  ;;  %v871_v54 = vmul.f32 %v1224_v29, %v867_v48 }
 0x209   : > { %v878_v52 = vperm.slane %v870_v49, 0  ;;  %v877_v53 = vperm.slane %v869_v50, 0  ;;  %v876_v17 = vperm.slane %v868_v51, 0  ;;  %v879_v55 = vperm.slane %v871_v54, 0 }
 0x20b   : > { %889 = vperm.xlu0 %1203, %v878_v52   ;;  %885 = vperm.xlu2 %1204, %v877_v53  }
 0x20c   : > { %881 = vperm.xlu1 %1205, %v876_v17  }
 0x214   : > { %893 = vperm.xlu1 %1205, %v879_v55  }
 0x22e   : > { %v752_v61 = vpop.f32.mrf.mxu2 }
 0x22f   : > { %v753_v0 = vadd.f32 %v1208_v59, %v752_v61 }
 0x265   : > { %v886_v56 = vpop.permute.xlu2 %885 }
 0x266   : > { %v897_v60 = vmul.f32 %v886_v56, %v1689_v47 }
 0x27d   : > { %v890_v62 = vpop.permute.xlu0 %889 }
 0x27e   : > { %v882_v57 = vpop.permute.xlu1 %881  ;;  %v898_v1 = vmul.f32 %v890_v62, %v1667_v28 }
 0x27f   : > { %v896_v58 = vmul.f32 %v882_v57, %v1686_v44  ;;  %v772_v44 = vpop.f32.mrf.mxu3 }
 0x280   : > { %v773_v28 = vadd.f32 %v772_v44, %v753_v0 }
 0x281   : > { %v900_v63 = vadd.f32 %v897_v60, %v896_v58 }
 0x283   : > { %v901_v3 = vadd.f32 %v900_v63, %v898_v1 }
 0x286   : > { %v894_v2 = vpop.permute.xlu1 %893 }
 0x287   : > { %v899_v47 = vmul.f32 %v894_v2, %v1680_v35 }
 0x289   : > { %v902_v4 = vadd.f32 %v901_v3, %v899_v47 }
 0x28b   : > { %v903_v6 = vadd.f32 %v902_v4, %v773_v28 }
 0x28d   : > { %1109 = vst [vmem:[%s1619_s11 + $0x38] sm:$0xff] %v903_v6 }
 0x28e   : > { %910 = vst [vmem:[%s429_s17] sm:$0xff] %v903_v6 }
 0x28f   : > { %1346 = shalt.err (!%p1343_p12)
}
 0x290   : > { %1129 = dma.vmem_to_hbm [thread:$0]  (%p1560_p3), %s930_s22, 128, %s932_s30, %s912_s18  }
 0x291   : > { %s917_s11 = scalar_lea.sflag [#allocation10], %s1593_s29  ;;  %s1361_s25 = sshra.s32 %s1736_s12, 4  ;;  %s1362_s25 = int_to_ptr.hbm [resolvable:$true] %s1361_s25 }
 0x292   : > { %s1363_s17 = scalar_lea.hbm %s1362_s25, 64  ;;  %s1367_s23 = scalar_lea.hbm %s1791_s10, 128 }
 0x293   : > { %p1364_p13 = scmp.ne.s32.totalorder %s1362_s25, %s1363_s17  ;;  %p1368_p7 = scmp.lt.s32.totalorder %s1362_s25, %s1791_s10 }
 0x294   : > { %p1369_p8 = scmp.lt.s32.totalorder %s1367_s23, %s1363_s17 }
 0x295   : > { %p1365_p0 = pnand %p1364_p13, %p1560_p3 }
 0x296   : > { %p1370_p1 = por %p1369_p8, %p1368_p7 }
 0x297   : > { %p1366_p5 = pneg %p1365_p0 }
 0x299   : > { %p1371_p4 = pnand %p1370_p1, %p1366_p5 }
 0x29b   : > { %1374 = shalt.err (!%p1371_p4)
}
 0x29c   : > { %s1431_s29 = smov 128   ;;  %s1432_s22 = smov 8  }
 0x29d   : > { %1130 = dma.vmem_to_hbm [thread:$0]  (%p1560_p3), %s1733_s19, 1024, %s1736_s12, %s917_s11, %s1431_s29, %s1431_s29, %s1432_s22  }
 0x29e PF: > { %s960_s30 = sand.u32 1, %s1409_s13   ;;  %p1810_p11 = scmp.ge.s32.totalorder %s1421_s16, 2 }
 0x29f   : > { %s961_s18 = scalar_lea.sflag [#allocation4], %s960_s30 }
 0x2a0   : > { %p1145_p2 = pnand %p1810_p11, %p1523_p6 }
 0x2a2   : > { %p1146_p9 = pneg %p1145_p2 }
 0x2a4   : > { %1400 = dma.done.wait (%p1146_p9), %s961_s18, 128  }
 0x2a5   : > { %1402 = vsyncadd (%p1146_p9), %s961_s18, 4294967168  ;;  %s971_s28 = scalar_lea.sflag [#allocation10], %s960_s30 }
 0x2a6   : > { %1404 = dma.done.wait (%p1146_p9), %s971_s28, 1024  }
 0x2a7   : > { %1406 = vsyncadd (%p1146_p9), %s971_s28, 4294966272  ;;  %s1811_s24 = sld [smem:[#allocation15_spill]]  ;;  %p28_p3 = scmp.ge.s32.totalorder %s1550_s21, 4  }
 0x2a8   : > { %s1812_s15 = sld [smem:[#allocation16_spill]]  ;;  %s1813_s13 = smov %s1413_s14 }
 0x2a9   : > { %s1815_s16 = smov %s1550_s21  ;;  %30 = sbr.rel (!%p28_p3) target bundleno = 11 (0xb), region = 138 }
 0x2ad   : > { %s1814_s14 = smov %s1811_s24 }
 0x2ae   :  { %977 = vsyncpa [#allocation3], 1 }
 0x2af   :  { %979 = vsyncpa [#allocation3 + $0x1], 1 }
 0x2b0   :  { %980 = vsyncpa [#allocation6], 1 }
 0x2b1   :  { %981 = vsyncpa [#allocation4], 1 }
 0x2b2   :  { %983 = vsyncpa [#allocation4 + $0x1], 1 }
 0x2b3   :  { %984 = vsyncpa [#allocation10], 1 }
 0x2b4   :  { %986 = vsyncpa [#allocation10 + $0x1], 1 }

</bundles_post_ra>
